<compile_context>
chip_gen: v5e
topology: v5e:2x2
jax: 0.10.0
libtpu: 0.0.40
codegen_flags: <defaults>
</compile_context>

<pallas_src>
import functools

import numpy as np

import jax
import jax.numpy as jnp
from jax.experimental import pallas as pl
from jax.experimental.pallas import tpu as pltpu


# ----------------------------------------------------------------------------
# Host-side helpers: dense 1-D interpolation / padding operators
# ----------------------------------------------------------------------------
def _interp_matrix(in_size, out_size):
    """(out_size, in_size) matrix of 1-D linear interpolation, align_corners=True."""
    m = np.zeros((out_size, in_size), dtype=np.float32)
    if in_size == 1 or out_size == 1:
        m[:, 0] = 1.0
        return m
    scale = (in_size - 1) / (out_size - 1)
    for i in range(out_size):
        src = i * scale
        i0 = min(max(int(np.floor(src)), 0), in_size - 1)
        i1 = min(i0 + 1, in_size - 1)
        w1 = src - i0
        m[i, i0] += 1.0 - w1
        m[i, i1] += w1
    return m


def _pad_matrix(in_size, out_size):
    """(out_size, in_size) matrix placing the input at offset diff//2 (F.pad semantics)."""
    diff = out_size - in_size
    # TODO(synk): negative diff (cropping via F.pad with negative pads) not supported.
    assert diff >= 0, "pad matrix: output must be at least as large as input"
    lo = diff // 2
    p = np.zeros((out_size, in_size), dtype=np.float32)
    for j in range(in_size):
        p[lo + j, j] = 1.0
    return p


# ----------------------------------------------------------------------------
# Fused Pallas kernel: upsample + pad + concat + (conv->BN->ReLU) x 2
# ----------------------------------------------------------------------------
def _up_kernel(x1_ref, x2_ref, mt_ref,
               k1_ref, s1_ref, b1_ref, k2_ref, s2_ref, b2_ref,
               o_ref, *, W2, HW):
    f32 = jnp.float32

    # --- Stage 1: bilinear upsample (align_corners=True) + F.pad of x1.
    #     One MXU matmul against the precomputed kron(A_H, A_W)^T operator.
    #     x1_ref: (C1, H1*W1), mt_ref: (H1*W1, H2*W2) -> up: (C1, H2*W2).
    up = jnp.dot(x1_ref[...], mt_ref[...], preferred_element_type=f32)

    # --- Stage 2: concat [x2, up] along channels (sublane axis), channels-major.
    z = jnp.concatenate([x2_ref[...].astype(f32), up], axis=0)        # (Cin, HW)

    # --- Stage 3 & 4: (3,1) conv -> folded BatchNorm affine -> ReLU, twice.
    #     The three H-taps are stacked along the contraction dim so the whole conv
    #     is a single MXU matmul: (Cout, 3*Cin) @ (3*Cin, HW).
    def conv_bn_relu(zz, k_ref, s_ref, b_ref):
        c = zz.shape[0]
        zero = jnp.zeros((c, W2), dtype=zz.dtype)
        z_hm1 = jnp.concatenate([zero, zz[:, :HW - W2]], axis=1)       # input row h-1
        z_hp1 = jnp.concatenate([zz[:, W2:], zero], axis=1)            # input row h+1
        z_all = jnp.concatenate([z_hm1, zz, z_hp1], axis=0)            # (3*Cin, HW)
        y = jnp.dot(k_ref[...], z_all, preferred_element_type=f32)     # (Cout, HW)
        y = y * s_ref[...] + b_ref[...]     # BatchNorm (inference) as per-channel affine
        return jnp.maximum(y, 0.0)          # ReLU

    a1 = conv_bn_relu(z, k1_ref, s1_ref, b1_ref)                       # (Cmid, HW)
    a2 = conv_bn_relu(a1, k2_ref, s2_ref, b2_ref)                      # (Cout, HW)

    # Channels-major store: output last dim = H*W (lane-dense, unmasked stores);
    # the wrapper reshape back to NCHW is a free, contiguous reshape.
    o_ref[...] = a2.astype(o_ref.dtype)


def up_pallas(x1, x2, mt, k1, s1, b1, k2, s2, b2):
    """One fused pallas_call implementing Up.forward(x1, x2) (bilinear path)."""
    N, C1, H1, W1 = x1.shape
    _, C2, H2, W2 = x2.shape
    S1 = H1 * W1
    HW = H2 * W2
    Cin = C1 + C2
    Cmid = k1.shape[0]
    Cout = k2.shape[0]

    x1f = x1.reshape(N, C1, S1)    # free, contiguous reshapes (NCHW row-major)
    x2f = x2.reshape(N, C2, HW)

    kernel = functools.partial(_up_kernel, W2=W2, HW=HW)

    out_flat = pl.pallas_call(
        kernel,
        out_shape=jax.ShapeDtypeStruct((N, Cout, HW), x1.dtype),
        grid_spec=pltpu.PrefetchScalarGridSpec(
            num_scalar_prefetch=0,
            grid=(N,),
            in_specs=[
                pl.BlockSpec((None, C1, S1), lambda n: (n, 0, 0)),   # x1 (flat spatial)
                pl.BlockSpec((None, C2, HW), lambda n: (n, 0, 0)),   # x2 (flat spatial)
                pl.BlockSpec((S1, HW),       lambda n: (0, 0)),      # kron(A_H, A_W)^T
                pl.BlockSpec((Cmid, 3 * Cin),  lambda n: (0, 0)),    # conv1 taps (stacked)
                pl.BlockSpec((Cmid, 1),        lambda n: (0, 0)),    # BN1 scale
                pl.BlockSpec((Cmid, 1),        lambda n: (0, 0)),    # BN1 shift
                pl.BlockSpec((Cout, 3 * Cmid), lambda n: (0, 0)),    # conv2 taps (stacked)
                pl.BlockSpec((Cout, 1),        lambda n: (0, 0)),    # BN2 scale
                pl.BlockSpec((Cout, 1),        lambda n: (0, 0)),    # BN2 shift
            ],
            out_specs=pl.BlockSpec((None, Cout, HW), lambda n: (n, 0, 0)),
        ),
        compiler_params=pltpu.CompilerParams(
            dimension_semantics=("parallel",)),
    )(x1f, x2f, mt, k1, s1, b1, k2, s2, b2)

    return out_flat.reshape(N, Cout, H2, W2)


# ----------------------------------------------------------------------------
# Module wrapper (parameter setup mirrors Up(in_channels, out_channels, bilinear=True))
# ----------------------------------------------------------------------------
class PallasUp:
    def __init__(self, in_channels, out_channels, *, key, eps=1e-5):
        mid = in_channels // 2
        k_c1, k_c2, k_b1, k_b2 = jax.random.split(key, 4)

        def conv_w(kk, cin, cout):
            # Conv2d default init: U(-1/sqrt(fan_in), 1/sqrt(fan_in)), fan_in = cin*3*1.
            bound = 1.0 / ((cin * 3) ** 0.5)
            # Stored as taps (kh, cin, cout): taps[kh] == W_torch[:, :, kh, 0].T
            return jax.random.uniform(kk, (3, cin, cout), jnp.float32, -bound, bound)

        def bn_affine(kk, c):
            kg, kb, km, kv = jax.random.split(kk, 4)
            gamma = jax.random.uniform(kg, (c,), jnp.float32, 0.5, 1.5)
            beta = 0.1 * jax.random.normal(kb, (c,), jnp.float32)
            mean = 0.1 * jax.random.normal(km, (c,), jnp.float32)
            var = jax.random.uniform(kv, (c,), jnp.float32, 0.5, 1.5)
            scale = gamma / jnp.sqrt(var + eps)
            shift = beta - mean * scale
            return scale.reshape(c, 1), shift.reshape(c, 1)

        self.in_channels = in_channels
        self.out_channels = out_channels
        self.mid_channels = mid

        # Reference-form taps (kh, cin, cout) and kernel-form matrices (cout, 3*cin),
        # where k_mat[co, kh*cin + ci] == taps[kh, ci, co].
        self.k1 = conv_w(k_c1, in_channels, mid)
        self.k2 = conv_w(k_c2, mid, out_channels)
        self.k1_mat = jnp.transpose(self.k1, (2, 0, 1)).reshape(mid, 3 * in_channels)
        self.k2_mat = jnp.transpose(self.k2, (2, 0, 1)).reshape(out_channels, 3 * mid)
        self.s1, self.b1 = bn_affine(k_b1, mid)
        self.s2, self.b2 = bn_affine(k_b2, out_channels)

    def __call__(self, x1, x2):
        N, C1, H1, W1 = x1.shape
        N2, C2, H2, W2 = x2.shape
        assert N == N2 and C1 + C2 == self.in_channels
        # (pad o bilinear-upsample) as dense operators along each spatial axis, combined
        # into one (H1*W1, H2*W2) operator so the in-kernel upsample is a single matmul.
        a_h = _pad_matrix(2 * H1, H2) @ _interp_matrix(H1, 2 * H1)    # (H2, H1)
        a_w = _pad_matrix(2 * W1, W2) @ _interp_matrix(W1, 2 * W1)    # (W2, W1)
        mt = jnp.asarray(np.kron(a_h, a_w).T)                         # (H1*W1, H2*W2)
        return up_pallas(x1, x2, mt,
                         self.k1_mat, self.s1, self.b1,
                         self.k2_mat, self.s2, self.b2)


# ----------------------------------------------------------------------------
# Pure-JAX reference (independent implementation, mirrors the PyTorch forward)
# ----------------------------------------------------------------------------
def _bilinear_upsample_align_corners(x, out_h, out_w):
    def interp_1d(x, axis, out_size):
        in_size = x.shape[axis]
        if in_size == 1:
            return jnp.take(x, jnp.zeros((out_size,), jnp.int32), axis=axis)
        src = jnp.arange(out_size, dtype=jnp.float32) * ((in_size - 1) / (out_size - 1))
        i0 = jnp.clip(jnp.floor(src).astype(jnp.int32), 0, in_size - 1)
        i1 = jnp.clip(i0 + 1, 0, in_size - 1)
        w1 = src - i0.astype(jnp.float32)
        shape = [1] * x.ndim
        shape[axis] = out_size
        w1 = w1.reshape(shape)
        return jnp.take(x, i0, axis=axis) * (1.0 - w1) + jnp.take(x, i1, axis=axis) * w1

    return interp_1d(interp_1d(x, 2, out_h), 3, out_w)


def reference_up(x1, x2, k1, s1, b1, k2, s2, b2):
    N, C1, H1, W1 = x1.shape
    _, C2, H2, W2 = x2.shape
    x1u = _bilinear_upsample_align_corners(x1, 2 * H1, 2 * W1)
    dY = H2 - x1u.shape[2]
    dX = W2 - x1u.shape[3]
    x1u = jnp.pad(x1u, ((0, 0), (0, 0),
                        (dY // 2, dY - dY // 2), (dX // 2, dX - dX // 2)))
    x = jnp.concatenate([x2, x1u], axis=1)

    def conv_bn_relu(x, k, s, b):
        w = jnp.transpose(k, (2, 1, 0))[..., None]     # (Cout, Cin, 3, 1)
        y = jax.lax.conv_general_dilated(
            x, w, window_strides=(1, 1), padding=((1, 1), (0, 0)),
            dimension_numbers=("NCHW", "OIHW", "NCHW"),
            precision=jax.lax.Precision.HIGHEST)
        y = y * s.reshape(1, -1, 1, 1) + b.reshape(1, -1, 1, 1)
        return jnp.maximum(y, 0.0)

    y = conv_bn_relu(x, k1, s1, b1)
    return conv_bn_relu(y, k2, s2, b2)


# ----------------------------------------------------------------------------
if __name__ == "__main__":
    key = jax.random.PRNGKey(0)
    k_x1, k_x2, k_p = jax.random.split(key, 3)

    N = 2
    in_channels = 16                 # channels after concat (= C1 + C2)
    out_channels = 16
    C1 = in_channels // 2            # low-res feature map x1 channels
    C2 = in_channels - C1            # skip connection x2 channels
    H1, W1 = 8, 8
    H2, W2 = 2 * H1, 2 * W1          # skip connection spatial size

    x1 = jax.random.normal(k_x1, (N, C1, H1, W1), jnp.float32)
    x2 = jax.random.normal(k_x2, (N, C2, H2, W2), jnp.float32)

    up = PallasUp(in_channels, out_channels, key=k_p)
    out = jax.block_until_ready(up(x1, x2))

    ref = reference_up(x1, x2, up.k1, up.s1, up.b1, up.k2, up.s2, up.b2)
    assert out.shape == (N, out_channels, H2, W2)
    max_err = float(jnp.max(jnp.abs(out - ref)))
    assert jnp.allclose(out, ref, atol=5e-4, rtol=5e-4), f"mismatch vs reference: {max_err}"

    print("KERNEL_OK")
</pallas_src>

<mosaic_0001>
module attributes {stable_mosaic.version = 11 : i64} {
  func.func @_up_kernel(%arg0: i32, %arg1: memref<1x8x64xf32, #tpu.memory_space<vmem>>, %arg2: memref<1x8x256xf32, #tpu.memory_space<vmem>>, %arg3: memref<64x256xf32, #tpu.memory_space<vmem>>, %arg4: memref<8x48xf32, #tpu.memory_space<vmem>>, %arg5: memref<8x1xf32, #tpu.memory_space<vmem>>, %arg6: memref<8x1xf32, #tpu.memory_space<vmem>>, %arg7: memref<16x24xf32, #tpu.memory_space<vmem>>, %arg8: memref<16x1xf32, #tpu.memory_space<vmem>>, %arg9: memref<16x1xf32, #tpu.memory_space<vmem>>, %arg10: memref<1x16x256xf32, #tpu.memory_space<vmem>>) attributes {dimension_semantics = [#tpu.dimension_semantics<parallel>], iteration_bounds = array<i64: 2>, scalar_prefetch = 0 : i64, scratch_operands = 0 : i64, tpu.core_type = #tpu.core_type<tc>, window_params = [{transform_indices = @transform_0, window_bounds = array<i64: 1, 8, 64>}, {transform_indices = @transform_1, window_bounds = array<i64: 1, 8, 256>}, {pipeline_mode = #tpu.pipeline_mode<synchronous>, transform_indices = @transform_2, window_bounds = array<i64: 64, 256>}, {pipeline_mode = #tpu.pipeline_mode<synchronous>, transform_indices = @transform_3, window_bounds = array<i64: 8, 48>}, {pipeline_mode = #tpu.pipeline_mode<synchronous>, transform_indices = @transform_4, window_bounds = array<i64: 8, 1>}, {pipeline_mode = #tpu.pipeline_mode<synchronous>, transform_indices = @transform_5, window_bounds = array<i64: 8, 1>}, {pipeline_mode = #tpu.pipeline_mode<synchronous>, transform_indices = @transform_6, window_bounds = array<i64: 16, 24>}, {pipeline_mode = #tpu.pipeline_mode<synchronous>, transform_indices = @transform_7, window_bounds = array<i64: 16, 1>}, {pipeline_mode = #tpu.pipeline_mode<synchronous>, transform_indices = @transform_8, window_bounds = array<i64: 16, 1>}, {transform_indices = @transform_9, window_bounds = array<i64: 1, 16, 256>}]} {
    %c0 = arith.constant 0 : index
    %c0_0 = arith.constant 0 : index
    %c0_1 = arith.constant 0 : index
    %0 = vector.load %arg1[%c0, %c0_0, %c0_1] : memref<1x8x64xf32, #tpu.memory_space<vmem>>, vector<1x8x64xf32>
    %1 = vector.shape_cast %0 : vector<1x8x64xf32> to vector<8x64xf32>
    %c0_2 = arith.constant 0 : index
    %c0_3 = arith.constant 0 : index
    %2 = vector.load %arg3[%c0_2, %c0_3] : memref<64x256xf32, #tpu.memory_space<vmem>>, vector<64x256xf32>
    %cst = arith.constant dense<0.000000e+00> : vector<8x256xf32>
    %3 = tpu.matmul %1, %2, %cst {dimension_numbers = #tpu.dot_dimension_numbers<[1], [0], [0], [1], [0, 0, 1, 1], [], []>} : vector<8x64xf32>, vector<64x256xf32>, vector<8x256xf32> -> vector<8x256xf32>
    %c0_4 = arith.constant 0 : index
    %c0_5 = arith.constant 0 : index
    %c0_6 = arith.constant 0 : index
    %4 = vector.load %arg2[%c0_4, %c0_5, %c0_6] : memref<1x8x256xf32, #tpu.memory_space<vmem>>, vector<1x8x256xf32>
    %5 = vector.shape_cast %4 : vector<1x8x256xf32> to vector<8x256xf32>
    %6 = tpu.concatenate %5, %3 in 0 : vector<8x256xf32>, vector<8x256xf32> -> vector<16x256xf32>
    %cst_7 = arith.constant 0.000000e+00 : f32
    %7 = vector.broadcast %cst_7 : f32 to vector<16x16xf32>
    %8 = vector.extract_strided_slice %6 {offsets = [0, 0], sizes = [16, 240], strides = [1, 1]} : vector<16x256xf32> to vector<16x240xf32>
    %9 = tpu.concatenate %7, %8 in 1 : vector<16x16xf32>, vector<16x240xf32> -> vector<16x256xf32>
    %10 = vector.extract_strided_slice %6 {offsets = [0, 16], sizes = [16, 240], strides = [1, 1]} : vector<16x256xf32> to vector<16x240xf32>
    %11 = tpu.concatenate %10, %7 in 1 : vector<16x240xf32>, vector<16x16xf32> -> vector<16x256xf32>
    %12 = tpu.concatenate %9, %6, %11 in 0 : vector<16x256xf32>, vector<16x256xf32>, vector<16x256xf32> -> vector<48x256xf32>
    %c0_8 = arith.constant 0 : index
    %c0_9 = arith.constant 0 : index
    %13 = vector.load %arg4[%c0_8, %c0_9] : memref<8x48xf32, #tpu.memory_space<vmem>>, vector<8x48xf32>
    %cst_10 = arith.constant dense<0.000000e+00> : vector<8x256xf32>
    %14 = tpu.matmul %13, %12, %cst_10 {dimension_numbers = #tpu.dot_dimension_numbers<[1], [0], [0], [1], [0, 0, 1, 1], [], []>} : vector<8x48xf32>, vector<48x256xf32>, vector<8x256xf32> -> vector<8x256xf32>
    %c0_11 = arith.constant 0 : index
    %c0_12 = arith.constant 0 : index
    %15 = vector.load %arg5[%c0_11, %c0_12] : memref<8x1xf32, #tpu.memory_space<vmem>>, vector<8x1xf32>
    %16 = vector.broadcast %15 : vector<8x1xf32> to vector<8x256xf32>
    %17 = arith.mulf %14, %16 : vector<8x256xf32>
    %c0_13 = arith.constant 0 : index
    %c0_14 = arith.constant 0 : index
    %18 = vector.load %arg6[%c0_13, %c0_14] : memref<8x1xf32, #tpu.memory_space<vmem>>, vector<8x1xf32>
    %19 = vector.broadcast %18 : vector<8x1xf32> to vector<8x256xf32>
    %20 = arith.addf %17, %19 : vector<8x256xf32>
    %cst_15 = arith.constant 0.000000e+00 : f32
    %21 = vector.broadcast %cst_15 : f32 to vector<8x256xf32>
    %22 = arith.maximumf %20, %21 : vector<8x256xf32>
    %cst_16 = arith.constant 0.000000e+00 : f32
    %23 = vector.broadcast %cst_16 : f32 to vector<8x16xf32>
    %24 = vector.extract_strided_slice %22 {offsets = [0, 0], sizes = [8, 240], strides = [1, 1]} : vector<8x256xf32> to vector<8x240xf32>
    %25 = tpu.concatenate %23, %24 in 1 : vector<8x16xf32>, vector<8x240xf32> -> vector<8x256xf32>
    %26 = vector.extract_strided_slice %22 {offsets = [0, 16], sizes = [8, 240], strides = [1, 1]} : vector<8x256xf32> to vector<8x240xf32>
    %27 = tpu.concatenate %26, %23 in 1 : vector<8x240xf32>, vector<8x16xf32> -> vector<8x256xf32>
    %28 = tpu.concatenate %25, %22, %27 in 0 : vector<8x256xf32>, vector<8x256xf32>, vector<8x256xf32> -> vector<24x256xf32>
    %c0_17 = arith.constant 0 : index
    %c0_18 = arith.constant 0 : index
    %29 = vector.load %arg7[%c0_17, %c0_18] : memref<16x24xf32, #tpu.memory_space<vmem>>, vector<16x24xf32>
    %cst_19 = arith.constant dense<0.000000e+00> : vector<16x256xf32>
    %30 = tpu.matmul %29, %28, %cst_19 {dimension_numbers = #tpu.dot_dimension_numbers<[1], [0], [0], [1], [0, 0, 1, 1], [], []>} : vector<16x24xf32>, vector<24x256xf32>, vector<16x256xf32> -> vector<16x256xf32>
    %c0_20 = arith.constant 0 : index
    %c0_21 = arith.constant 0 : index
    %31 = vector.load %arg8[%c0_20, %c0_21] : memref<16x1xf32, #tpu.memory_space<vmem>>, vector<16x1xf32>
    %32 = vector.broadcast %31 : vector<16x1xf32> to vector<16x256xf32>
    %33 = arith.mulf %30, %32 : vector<16x256xf32>
    %c0_22 = arith.constant 0 : index
    %c0_23 = arith.constant 0 : index
    %34 = vector.load %arg9[%c0_22, %c0_23] : memref<16x1xf32, #tpu.memory_space<vmem>>, vector<16x1xf32>
    %35 = vector.broadcast %34 : vector<16x1xf32> to vector<16x256xf32>
    %36 = arith.addf %33, %35 : vector<16x256xf32>
    %cst_24 = arith.constant 0.000000e+00 : f32
    %37 = vector.broadcast %cst_24 : f32 to vector<16x256xf32>
    %38 = arith.maximumf %36, %37 : vector<16x256xf32>
    %c0_25 = arith.constant 0 : index
    %c0_26 = arith.constant 0 : index
    %c0_27 = arith.constant 0 : index
    %39 = vector.load %arg10[%c0_25, %c0_26, %c0_27] : memref<1x16x256xf32, #tpu.memory_space<vmem>>, vector<1x16x256xf32>
    %40 = vector.shape_cast %39 : vector<1x16x256xf32> to vector<16x256xf32>
    %41 = vector.shape_cast %38 : vector<16x256xf32> to vector<1x16x256xf32>
    tpu.vector_store %arg10[%c0_25, %c0_26, %c0_27], %41 {strides = array<i32>} : memref<1x16x256xf32, #tpu.memory_space<vmem>>, vector<1x16x256xf32>,
    return
  }
  func.func @transform_0(%arg0: i32) -> (i32, i32, i32) {
    %c0_i32 = arith.constant 0 : i32
    %c0_i32_0 = arith.constant 0 : i32
    %c0_i32_1 = arith.constant 0 : i32
    return %arg0, %c0_i32, %c0_i32_0 : i32, i32, i32
  }
  func.func @transform_1(%arg0: i32) -> (i32, i32, i32) {
    %c0_i32 = arith.constant 0 : i32
    %c0_i32_0 = arith.constant 0 : i32
    %c0_i32_1 = arith.constant 0 : i32
    return %arg0, %c0_i32, %c0_i32_0 : i32, i32, i32
  }
  func.func @transform_2(%arg0: i32) -> (i32, i32) {
    %c0_i32 = arith.constant 0 : i32
    %c0_i32_0 = arith.constant 0 : i32
    %c0_i32_1 = arith.constant 0 : i32
    return %c0_i32, %c0_i32_0 : i32, i32
  }
  func.func @transform_3(%arg0: i32) -> (i32, i32) {
    %c0_i32 = arith.constant 0 : i32
    %c0_i32_0 = arith.constant 0 : i32
    %c0_i32_1 = arith.constant 0 : i32
    return %c0_i32, %c0_i32_0 : i32, i32
  }
  func.func @transform_4(%arg0: i32) -> (i32, i32) {
    %c0_i32 = arith.constant 0 : i32
    %c0_i32_0 = arith.constant 0 : i32
    %c0_i32_1 = arith.constant 0 : i32
    return %c0_i32, %c0_i32_0 : i32, i32
  }
  func.func @transform_5(%arg0: i32) -> (i32, i32) {
    %c0_i32 = arith.constant 0 : i32
    %c0_i32_0 = arith.constant 0 : i32
    %c0_i32_1 = arith.constant 0 : i32
    return %c0_i32, %c0_i32_0 : i32, i32
  }
  func.func @transform_6(%arg0: i32) -> (i32, i32) {
    %c0_i32 = arith.constant 0 : i32
    %c0_i32_0 = arith.constant 0 : i32
    %c0_i32_1 = arith.constant 0 : i32
    return %c0_i32, %c0_i32_0 : i32, i32
  }
  func.func @transform_7(%arg0: i32) -> (i32, i32) {
    %c0_i32 = arith.constant 0 : i32
    %c0_i32_0 = arith.constant 0 : i32
    %c0_i32_1 = arith.constant 0 : i32
    return %c0_i32, %c0_i32_0 : i32, i32
  }
  func.func @transform_8(%arg0: i32) -> (i32, i32) {
    %c0_i32 = arith.constant 0 : i32
    %c0_i32_0 = arith.constant 0 : i32
    %c0_i32_1 = arith.constant 0 : i32
    return %c0_i32, %c0_i32_0 : i32, i32
  }
  func.func @transform_9(%arg0: i32) -> (i32, i32, i32) {
    %c0_i32 = arith.constant 0 : i32
    %c0_i32_0 = arith.constant 0 : i32
    %c0_i32_1 = arith.constant 0 : i32
    return %arg0, %c0_i32, %c0_i32_0 : i32, i32, i32
  }
}

</mosaic_0001>

<bundles_post_ra>
// kernel: tpu_custom_call.1
= control target key start
LH: loop header
LB: loop body
LE: loop exit
PB: predicated region body
PF: predicated region fallthrough
CT: control target
= control target key end

     0   :  { %s1347_s0 = inlined_call_operand.vmem [shape: f32[2,8,64], index: 0, kind: input, shape index: {}]   ;;  %s1348_s1 = inlined_call_operand.vmem [shape: f32[2,8,256], index: 1, kind: input, shape index: {}]   ;;  %s1349_s2 = inlined_call_operand.hbm [shape: f32[64,256], index: 2, kind: input, shape index: {}]   ;;  %s1350_s3 = inlined_call_operand.hbm [shape: f32[8,48], index: 3, kind: input, shape index: {}]   ;;  %s1351_s4 = inlined_call_operand.vmem [shape: f32[8,1], index: 4, kind: input, shape index: {}]   ;;  %s1352_s5 = inlined_call_operand.vmem [shape: f32[8,1], index: 5, kind: input, shape index: {}]   ;;  %s1353_s6 = inlined_call_operand.hbm [shape: f32[16,24], index: 6, kind: input, shape index: {}]   ;;  %s1354_s7 = inlined_call_operand.vmem [shape: f32[16,1], index: 7, kind: input, shape index: {}]   ;;  %s1355_s8 = inlined_call_operand.vmem [shape: f32[16,1], index: 8, kind: input, shape index: {}]   ;;  %s1356_s9 = inlined_call_operand.hbm [shape: f32[2,16,256], index: 9, kind: output, shape index: {}]  }
   0x1   :  { %1358 = sst [smem:[#allocation14_spill]] %s1349_s2 }
   0x2   :  { %1359 = sst [smem:[#allocation15_spill]] %s1350_s3 }
   0x3   :  { %14 = vsyncpa [#allocation3], 0 }
   0x4   :  { %15 = vsyncpa [#allocation6], 0 }
   0x5   :  { %16 = vsyncpa [#allocation4], 0 }
   0x6   :  { %18 = vsyncpa [#allocation4 + $0x1], 0  ;;  %s1152_s30 = smov 0   ;;  %s1154_s10 = smov 0  }
   0x7   :  { %s1156_s11 = smov 0   ;;  %s1158_s12 = smov 0  }
   0x8 LB: > { %1360 = sst [smem:[#allocation12_spill]] %s1085_s11  ;;  %s1173_s13 = sadd.s32 4294967295, %s1089_s12   ;;  %s1089_s12 = sphi %s1158_s12, %s1374_s12   ;;  %s1085_s11 = sphi %s1156_s11, %s1371_s11   ;;  %s1081_s10 = sphi %s1154_s10, %s1373_s10   ;;  %s1077_s30 = sphi %s1152_s30, %s1372_s30  }
   0x9   : > { %s794_s14 = sadd.s32 4294967294, %s1089_s12   ;;  %s1177_s15 = sadd.s32 1, %s1089_s12  }
   0xa   : > { %s230_s16 = sadd.s32 1, %s1085_s11  ;;  %s227_s17 = ssub.s32 %s1089_s12, %s1177_s15 }
   0xb   : > { %p240_p0 = scmp.ne.s32.totalorder %s1085_s11, %s1081_s10  ;;  %p228_p1 = scmp.eq.s32.totalorder %s227_s17, 0 }
   0xc   : > { %p241_p2 = scmp.eq.s32.totalorder %s1173_s13, 1  ;;  %p246_p3 = scmp.ne.s32.totalorder %s1081_s10, %s1077_s30 }
   0xd   : > { %p247_p4 = scmp.eq.s32.totalorder %s794_s14, 1  ;;  %p795_p7 = scmp.ge.s32.totalorder %s1089_s12, 1 }
   0xe   : > { %s1188_s18 = scalar_select %p228_p1, %s1085_s11, %s230_s16  }
   0xf   : > { %p1190_p5 = por %p241_p2, %p240_p0  ;;  %p1194_p6 = por %p247_p4, %p246_p3 }
  0x10   : > { %1361 = sst [smem:[#allocation13_spill]] %s1188_s18  ;;  %p254_p8 = scmp.lt.s32.totalorder %s1089_s12, 3 }
  0x11   : > { %p866_p9 = scmp.eq.s32.totalorder %s1173_s13, 0  ;;  %s1365_s3 = sld [smem:[#allocation15_spill]] }
  0x12   : > { %p1201_p10 = pnand %p795_p7, %p254_p8  ;;  %s1091_s25 = smov [#allocation5]  }
  0x13   : > { %s282_s26 = sshll.u32 %s1091_s25, 4  ;;  %s1366_s2 = sld [smem:[#allocation14_spill]]  ;;  %s283_s26 = int_to_ptr.vmem [resolvable:$true] %s282_s26 }
  0x14   : > { %p852_p11 = pneg %p1201_p10  ;;  %s1092_s16 = smov [#allocation2]  }
  0x15   : > { %s267_s17 = sshll.u32 %s1092_s16, 4  ;;  %s1093_s22 = smov 256   ;;  %s268_s17 = int_to_ptr.vmem [resolvable:$true] %s267_s17 }
  0x16   : > { %p1215_p12 = pnand %p866_p9, %p852_p11  ;;  %s1094_s23 = smov 16  }
  0x17   : > { %s280_s24 = sshll.u32 %s1365_s3, 4  ;;  %s297_s28 = sshll.u32 %s1353_s6, 4  ;;  %s281_s24 = int_to_ptr.hbm [resolvable:$true] %s280_s24  ;;  %s298_s28 = int_to_ptr.hbm [resolvable:$true] %s297_s28 }
  0x18   : > { %858 = dma.hbm_to_vmem [thread:$0]  (!%p1215_p12), %s281_s24, 128, %s283_s26, [#allocation6]  }
  0x19   : > { %s265_s29 = sshll.u32 %s1366_s2, 4  ;;  %s1095_s2 = smov [#allocation7]   ;;  %s266_s29 = int_to_ptr.hbm [resolvable:$true] %s265_s29 }
  0x1a   : > { %855 = dma.hbm_to_vmem [thread:$0]  (!%p1215_p12), %s266_s29, 2048, %s268_s17, [#allocation3], %s1093_s22, %s1093_s22, %s1094_s23  }
  0x1b   : > { %s299_s3 = sshll.u32 %s1095_s2, 4  ;;  %s1096_s18 = smov 128   ;;  %s300_s3 = int_to_ptr.vmem [resolvable:$true] %s299_s3 }
  0x1c   : > { %s1097_s11 = smov 8   ;;  %336 = sbr.rel (%p1201_p10) target bundleno = 716 (0x2cc), region = 56 }
  0x1d   : > { %861 = dma.hbm_to_vmem [thread:$0]  (!%p1215_p12), %s298_s28, 256, %s300_s3, [#allocation6], %s1096_s18, %s1096_s18, %s1097_s11  }
  0x21   : > { %1064 = dma.done.wait (%p866_p9), [#allocation3], 2048  }
  0x22   : > { %1066 = vsyncadd (%p866_p9), [#allocation3], 4294965248 }
  0x23   : > { %1068 = dma.done.wait (%p866_p9), [#allocation6], 384  }
  0x24   : > { %1070 = vsyncadd (%p866_p9), [#allocation6], 4294966912  ;;  %p387_p13 = scmp.lt.s32.totalorder %s1173_s13, 1  ;;  %v411_v0 = vld [vmem:[#allocation2 + $0x70] sm:$0xff]  ;;  %v409_v1 = vld [vmem:[#allocation2 + $0x60] sm:$0xff]  ;;  %s1098_s24 = smov 112  }
  0x25   : > { %425 = vmatpush.msra.mxu0 %v411_v0  ;;  %v412_v2 = vld [vmem:[#allocation2 + $0x78] sm:$0xff]  ;;  %v410_v3 = vld [vmem:[#allocation2 + $0x68] sm:$0xff]  ;;  %v407_v4 = vld [vmem:[#allocation2 + $0x50] sm:$0xff]  ;;  %vm413_vm0 = vcmask 523264   ;;  %s1099_s17 = smov 16   ;;  %v1100_v25 = vmov 0  }
  0x26   : > { %s1240_s2 = scalar_select %p387_p13, %s1173_s13, 1  ;;  %445 = vmatpush.msra.mxu1 %v412_v2  ;;  %v408_v5 = vld [vmem:[#allocation2 + $0x58] sm:$0xff]  ;;  %v405_v6 = vld [vmem:[#allocation2 + $0x40] sm:$0xff]  ;;  %v406_v7 = vld [vmem:[#allocation2 + $0x48] sm:$0xff]  ;;  %926 = vset.pattern.permute.xlu0 %v1100_v25  ;;  %vm488_vm1 = vcmask 916480   ;;  %vm471_vm2 = vcmask 130048  }
  0x27   : > { %426 = vmatpush.msra.mxu0 %v409_v1  ;;  %v403_v9 = vld [vmem:[#allocation2 + $0x30] sm:$0xff]  ;;  %v404_v10 = vld [vmem:[#allocation2 + $0x38] sm:$0xff]  ;;  %v401_v11 = vld [vmem:[#allocation2 + $0x20] sm:$0xff]  ;;  %927 = vset.pattern.permute.xlu1 %v1100_v25  ;;  %vm498_vm4 = vcmask 392192   ;;  %vm580_vm5 = vcmask 195584  }
  0x28   : > { %s830_s3 = sshll.u32 %s1240_s2, 4  ;;  %446 = vmatpush.msra.mxu1 %v410_v3  ;;  %s805_s26 = sshll.u32 %s1240_s2, 3  ;;  %v402_v12 = vld [vmem:[#allocation2 + $0x28] sm:$0xff]  ;;  %v399_v13 = vld [vmem:[#allocation2 + $0x10] sm:$0xff]  ;;  %v400_v14 = vld [vmem:[#allocation2 + $0x18] sm:$0xff]  ;;  %928 = vset.pattern.permute.xlu2 %v1100_v25 }
  0x29   : > { %s1246_s21 = scalar_lea.vmem %s1348_s1, %s830_s3  ;;  %427 = vmatpush.msra.mxu0 %v407_v4  ;;  %s390_s16 = scalar_lea.vmem %s1347_s0, %s805_s26  ;;  %v397_v15 = vld [vmem:[#allocation2] sm:$0xff]  ;;  %v398_v17 = vld [vmem:[#allocation2 + $0x8] sm:$0xff]  ;;  %vm1276_vm3 = vmneg %vm471_vm2 }
  0x2a   : > { %v1249_v8 = vld [vmem:[%s1246_s21 + $0x8] sm:$0xff]  ;;  %447 = vmatpush.msra.mxu1 %v408_v5  ;;  %v396_v16 = vld [vmem:[%s390_s16] sm:$0xff]  ;;  %v579_v63 = vld [vmem:[#allocation7 + $0x8] sm:$0xff]  ;;  %s831_s16 = sshll.u32 %s1173_s13, 5  ;;  %s1039_s26 = scalar_lea.hbm %s1356_s9, 64 }
  0x2b   : > { %482 = vrot.lane.b32.xlu1 %v1249_v8, %s1098_s24  ;;  %428 = vmatpush.msra.mxu0 %v405_v6  ;;  %v457_v18 = vld [vmem:[%s1246_s21] sm:$0xff]  ;;  %v650_v54 = vld [vmem:[%s1355_s8 + $0x8] sm:$0xff]  ;;  %s685_s25 = scalar_lea.hbm %s1356_s9, %s831_s16 }
  0x2c   : > { %448 = vmatpush.msra.mxu1 %v406_v7  ;;  %v542_v23 = vld [vmem:[%s1351_s4] sm:$0xff]  ;;  %v634_v55 = vld [vmem:[%s1354_s7 + $0x8] sm:$0xff]  ;;  %s688_s13 = sshll.u32 %s685_s25, 4  ;;  %s689_s13 = int_to_ptr.hbm [resolvable:$true] %s688_s13 }
  0x2d   : > { %429 = vmatpush.msra.mxu0 %v403_v9  ;;  %v550_v24 = vld [vmem:[%s1352_s5] sm:$0xff]  ;;  %v578_v62 = vld [vmem:[#allocation7] sm:$0xff]  ;;  %s1033_s3 = sshra.s32 %s689_s13, 4  ;;  %s1034_s3 = int_to_ptr.hbm [resolvable:$true] %s1033_s3 }
  0x2e   : > { %449 = vmatpush.msra.mxu1 %v404_v10  ;;  %v497_v40 = vld [vmem:[#allocation5] sm:$0xff]  ;;  %s1035_s11 = scalar_lea.hbm %s1034_s3, 32  ;;  %p1040_p3 = scmp.lt.s32.totalorder %s1034_s3, %s1356_s9 }
  0x2f   : > { %430 = vmatpush.msra.mxu0 %v401_v11  ;;  %v649_v52 = vld [vmem:[%s1355_s8] sm:$0xff]  ;;  %p1036_p0 = scmp.ne.s32.totalorder %s1034_s3, %s1035_s11  ;;  %p1041_p4 = scmp.lt.s32.totalorder %s1039_s26, %s1035_s11 }
  0x30   : > { %450 = vmatpush.msra.mxu1 %v402_v12  ;;  %v633_v53 = vld [vmem:[%s1354_s7] sm:$0xff] }
  0x31   : > { %431 = vmatpush.msra.mxu0 %v399_v13  ;;  %p1037_p1 = pnand %p1036_p0, %p1190_p5  ;;  %p1042_p7 = por %p1041_p4, %p1040_p3 }
  0x32   : > { %451 = vmatpush.msra.mxu1 %v400_v14 }
  0x33   : > { %432 = vmatpush.msra.mxu0 %v397_v15  ;;  %p1038_p2 = pneg %p1037_p1 }
  0x34   : > { %808 = vmatmul.msk.f32.vlgmr.msra.gmra.mxu0 %vm413_vm0, %v396_v16  ;;  %452 = vmatpush.msra.mxu1 %v398_v17 }
  0x35   : > { %809 = vmatmul.msk.f32.vlgmr.msra.gmra.mxu1 %vm413_vm0, %v396_v16  ;;  %p1043_p8 = pnand %p1042_p7, %p1038_p2 }
  0x9d   : > { %v483_v27 = vpop.permute.xlu1 %482 }
  0xb1   : > { %v434_v19 = vpop.f32.mrf.mxu0 }
  0xb2   : > { %467 = vrot.lane.b32.xlu1 %v434_v19, %s1099_s17  ;;  %v916_v20 = vpack.i.bf16 %v457_v18, %v434_v19  ;;  %v454_v21 = vpop.f32.mrf.mxu1 }
  0xb3   : > { %v921_v22 = vpack.i.bf16 %v1249_v8, %v454_v21 }
  0xb4   : > { %917 = vrot.lane.b32.xlu0 %v916_v20, %s1098_s24 }
  0xb5   : > { %922 = vrot.lane.b32.xlu2 %v921_v22, %s1099_s17 }
  0xba   : > { %553 = vperm.xlu1 %927, %v550_v24  }
  0xbc   : > { %486 = vrot.lane.b32.xlu0 %v454_v21, %s1098_s24 }
  0xbd   : > { %463 = vrot.lane.b32.xlu2 %v457_v18, %s1099_s17 }
  0xc4   : > { %545 = vperm.xlu0 %926, %v542_v23  }
 0x10f   : > { %v923_v28 = vpop.permute.xlu2 %922 }
 0x110   : > { %v925_v35 = vunpack.i.h.bf16 %v923_v28  ;;  %v924_v36 = vunpack.i.l.bf16 %v923_v28 }
 0x117   : > { %v464_v37 = vpop.permute.xlu2 %463 }
 0x118   : > { %v472_v41 = vsel %vm471_vm2, %v464_v37, %v925_v35 }
 0x124   : > { %v468_v34 = vpop.permute.xlu1 %467 }
 0x125   : > { %v473_v39 = vsel %vm471_vm2, %v468_v34, %v924_v36 }
 0x126   : > { %v918_v26 = vpop.permute.xlu0 %917 }
 0x127   : > { %v920_v29 = vunpack.i.h.bf16 %v918_v26  ;;  %v919_v30 = vunpack.i.l.bf16 %v918_v26 }
 0x129   : > { %v489_v33 = vsel %vm488_vm1, %v920_v29, %v483_v27 }
 0x12c   : > { %v554_v44 = vpop.permute.xlu1 %553 }
 0x12e   : > { %v487_v31 = vpop.permute.xlu0 %486 }
 0x12f   : > { %815 = vmatpush.msk.msra.mxu3 %vm488_vm1, %v487_v31  ;;  %v490_v32 = vsel %vm488_vm1, %v919_v30, %v487_v31 }
 0x130   : > { %512 = vmatpush.msra.mxu2 %v490_v32 }
 0x131   : > { %816 = vmatpush.msk.msra.mxu3 %vm488_vm1, %v483_v27 }
 0x132   : > { %513 = vmatpush.msra.mxu2 %v489_v33 }
 0x133   : > { %534 = vmatpush.msra.mxu3 %v454_v21 }
 0x134   : > { %514 = vmatpush.msra.mxu2 %v434_v19 }
 0x135   : > { %535 = vmatpush.msra.mxu3 %v1249_v8 }
 0x136   : > { %515 = vmatpush.msra.mxu2 %v457_v18  ;;  %v546_v42 = vpop.permute.xlu0 %545 }
 0x137   : > { %536 = vmatpush.msra.mxu3 %v473_v39 }
 0x138   : > { %811 = vmatpush.msk.msra.mxu2 %vm1276_vm3, %v468_v34 }
 0x139   : > { %537 = vmatpush.msra.mxu3 %v472_v41 }
 0x13a   : > { %813 = vmatpush.msk.msra.mxu2 %vm1276_vm3, %v464_v37  ;;  %817 = vmatmul.msk.f32.vlgmr.msra.gmra.mxu3 %vm498_vm4, %v497_v40 }
 0x13b   : > { %814 = vmatmul.msk.f32.vlgmr.msra.gmra.mxu2 %vm498_vm4, %v497_v40 }
 0x1bd   : > { %v539_v43 = vpop.f32.mrf.mxu3 }
 0x1be   : > { %v549_v45 = vmul.f32 %v546_v42, %v539_v43  ;;  %v519_v46 = vpop.f32.mrf.mxu2 }
 0x1bf   : > { %v548_v47 = vmul.f32 %v546_v42, %v519_v46 }
 0x1c0   : > { %v557_v48 = vadd.f32 %v554_v44, %v549_v45 }
 0x1c1   : > { %v556_v49 = vadd.f32 %v554_v44, %v548_v47 }
 0x1c2   : > { %v559_v50 = vmax.f32 %v557_v48, 0.0 }
 0x1c3   : > { %v558_v51 = vmax.f32 %v556_v49, 0.0 }
 0x1c4   : > { %564 = vrot.lane.b32.xlu0 %v559_v50, %s1099_s17  ;;  %572 = vrot.lane.b32.xlu1 %v559_v50, %s1098_s24 }
 0x1c5   : > { %570 = vrot.lane.b32.xlu2 %v558_v51, %s1098_s24  ;;  %s384_s24 = sand.u32 1, %s1081_s10  }
 0x1c6   : > { %s804_s14 = sshll.u32 %s384_s24, 5  ;;  %s674_s2 = scalar_lea.sflag [#allocation4], %s384_s24 }
 0x1c7   : > { %s386_s27 = scalar_lea.vmem [#allocation8], %s804_s14 }
 0x1c8   : > { %s686_s28 = sshll.u32 %s386_s27, 4  ;;  %s687_s28 = int_to_ptr.vmem [resolvable:$true] %s686_s28 }
 0x1cc   : > { %653 = vperm.xlu0 %926, %v649_v52   ;;  %637 = vperm.xlu1 %927, %v633_v53  }
 0x1cd   : > { %562 = vrot.lane.b32.xlu2 %v558_v51, %s1099_s17 }
 0x1d4   : > { %658 = vperm.xlu1 %927, %v650_v54  }
 0x1d5   : > { %642 = vperm.xlu2 %928, %v634_v55  }
 0x21f   : > { %v571_v56 = vpop.permute.xlu2 %570 }
 0x227   : > { %v563_v60 = vpop.permute.xlu2 %562 }
 0x22f   : > { %v643_v8 = vpop.permute.xlu2 %642 }
 0x236   : > { %v573_v57 = vpop.permute.xlu1 %572  ;;  %v565_v58 = vpop.permute.xlu0 %564 }
 0x237   : > { %822 = vmatpush.msk.msrb.mxu1 %vm488_vm1, %v573_v57  ;;  %835 = vmatpush.msk.msrb.mxu3 %vm488_vm1, %v573_v57  ;;  %v574_v59 = vsel %vm488_vm1, %v571_v56, %v573_v57  ;;  %v566_v61 = vsel %vm471_vm2, %v563_v60, %v565_v58 }
 0x238   : > { %600 = vmatpush.msrb.mxu0 %v574_v59  ;;  %832 = vmatpush.msrb.mxu2 %v574_v59 }
 0x239   : > { %624 = vmatpush.msrb.mxu1 %v559_v50  ;;  %836 = vmatpush.msrb.mxu3 %v559_v50 }
 0x23a   : > { %601 = vmatpush.msrb.mxu0 %v558_v51  ;;  %833 = vmatpush.msrb.mxu2 %v558_v51 }
 0x23b   : > { %625 = vmatpush.msrb.mxu1 %v566_v61  ;;  %837 = vmatpush.msrb.mxu3 %v566_v61 }
 0x23c   : > { %819 = vmatpush.msk.msrb.mxu0 %vm1276_vm3, %v563_v60  ;;  %834 = vmatpush.msk.msrb.mxu2 %vm1276_vm3, %v563_v60 }
 0x23d   : > { %823 = vmatmul.msk.f32.vlgmr.msrb.gmra.mxu1 %vm580_vm5, %v578_v62  ;;  %824 = vmatmul.msk.f32.vlgmr.msrb.gmra.mxu3 %vm580_vm5, %v579_v63 }
 0x23e   : > { %820 = vmatmul.msk.f32.vlgmr.msrb.gmra.mxu0 %vm580_vm5, %v578_v62  ;;  %821 = vmatmul.msk.f32.vlgmr.msrb.gmra.mxu2 %vm580_vm5, %v579_v63  ;;  %v638_v0 = vpop.permute.xlu1 %637  ;;  %v654_v4 = vpop.permute.xlu0 %653 }
 0x246   : > { %v659_v14 = vpop.permute.xlu1 %658 }
 0x2ba   : > { %v627_v1 = vpop.f32.mrf.mxu1 }
 0x2bb   : > { %v646_v2 = vmul.f32 %v638_v0, %v627_v1  ;;  %v604_v3 = vpop.f32.mrf.mxu0 }
 0x2bc   : > { %v645_v5 = vmul.f32 %v638_v0, %v604_v3 }
 0x2bd   : > { %v662_v6 = vadd.f32 %v654_v4, %v646_v2 }
 0x2be   : > { %v661_v7 = vadd.f32 %v654_v4, %v645_v5 }
 0x2bf   : > { %v666_v9 = vmax.f32 %v662_v6, 0.0 }
 0x2c0   : > { %v665_v10 = vmax.f32 %v661_v7, 0.0  ;;  %v630_v11 = vpop.f32.mrf.mxu3 }
 0x2c1   : > { %670 = vst [vmem:[%s386_s27 + $0x8] sm:$0xff] %v666_v9  ;;  %v648_v12 = vmul.f32 %v643_v8, %v630_v11  ;;  %v607_v13 = vpop.f32.mrf.mxu2 }
 0x2c2   : > { %669 = vst [vmem:[%s386_s27] sm:$0xff] %v665_v10  ;;  %v647_v15 = vmul.f32 %v643_v8, %v607_v13 }
 0x2c3   : > { %v664_v16 = vadd.f32 %v659_v14, %v648_v12 }
 0x2c4   : > { %v663_v17 = vadd.f32 %v659_v14, %v647_v15 }
 0x2c5   : > { %v668_v18 = vmax.f32 %v664_v16, 0.0 }
 0x2c6   : > { %v667_v19 = vmax.f32 %v663_v17, 0.0 }
 0x2c7   : > { %672 = vst [vmem:[%s386_s27 + $0x18] sm:$0xff] %v668_v18 }
 0x2c8   : > { %671 = vst [vmem:[%s386_s27 + $0x10] sm:$0xff] %v667_v19 }
 0x2c9   : > { %1046 = shalt.err (!%p1043_p8)
}
 0x2ca   : > { %s1101_s24 = smov 256  }
 0x2cb   : > { %850 = dma.vmem_to_hbm [thread:$0]  (%p1190_p5), %s687_s28, 512, %s689_s13, %s674_s2, %s1101_s24, %s1101_s24, %s1099_s17  }
 0x2cc PF: > { %p872_p9 = scmp.ge.s32.totalorder %s1089_s12, 2  ;;  %s703_s16 = sand.u32 1, %s1077_s30  }
 0x2cd   : > { %s704_s22 = scalar_lea.sflag [#allocation4], %s703_s16 }
 0x2ce   : > { %p863_p10 = pnand %p872_p9, %p1194_p6 }
 0x2d0   : > { %p864_p11 = pneg %p863_p10 }
 0x2d2   : > { %1072 = dma.done.wait (%p864_p11), %s704_s22, 512  }
 0x2d3   : > { %1074 = vsyncadd (%p864_p11), %s704_s22, 4294966784  ;;  %s1370_s23 = sld [smem:[#allocation12_spill]]  ;;  %p21_p12 = scmp.ge.s32.totalorder %s1177_s15, 4  }
 0x2d4   : > { %s1371_s11 = sld [smem:[#allocation13_spill]]  ;;  %s1372_s30 = smov %s1081_s10 }
 0x2d5   : > { %s1374_s12 = smov %s1177_s15  ;;  %23 = sbr.rel (!%p21_p12) target bundleno = 8 (0x8), region = 107 }
 0x2d9   : > { %s1373_s10 = smov %s1370_s23 }
 0x2da   :  { %710 = vsyncpa [#allocation3], 1 }
 0x2db   :  { %712 = vsyncpa [#allocation3 + $0x1], 1 }
 0x2dc   :  { %713 = vsyncpa [#allocation6], 1 }
 0x2dd   :  { %714 = vsyncpa [#allocation4], 1 }
 0x2de   :  { %716 = vsyncpa [#allocation4 + $0x1], 1 }

</bundles_post_ra>
